<compile_context>
chip_gen: v7x
topology: tpu7x:2x2x1
jax: 0.10.0
libtpu: 0.0.40
codegen_flags: <defaults>
</compile_context>

<pallas_src>
import jax
import jax.numpy as jnp
from jax.experimental import pallas as pl
from jax.experimental.pallas import tpu as pltpu

# Time bucket boundaries (static, from MLP.__init__): 22 values -> 21 buckets.
MIN_TIME = [i / 10.0 for i in range(0, 21)] + [1000.0]
N_LAYERS = 21
LEAKY_SLOPE = 0.1            # nn.LeakyReLU(0.1) in the source module
TILE_N = 8192                # lanes per grid step (review: sweep upward; VMEM-safe on v7x)


def _round_up(x, m):
    return ((x + m - 1) // m) * m


# ----------------------------- Pallas kernel --------------------------------
def _edge_mlp_kernel(feat_ref, colp_ref, table_ref, o_ref):
    """Fused FeatureTransform + per-lane bucket selection + single D-wide MLP.

    feat_ref : (D+1, TILE_N)  rows 0..D-1 = non-delta_t features, row D = delta_t
    colp_ref : (2D+2L, 1)     [a (D) | b_ft (D) | bucket lo (L) | bucket hi (L)]
    table_ref: (D*D+2D+1, L)  per-bucket params, column l = bucket l:
                              rows [0,D*D): W1[in=i,out=j] at i*D+j,
                              rows [D*D,D*D+D): b1, next D: w2, last row: b2
    o_ref    : (1, TILE_N)    summed edge costs (lane-dense)
    """
    d = feat_ref.shape[0] - 1
    L = N_LAYERS
    dd = d * d

    feat = feat_ref[...]                           # (D+1, T)
    x = feat[:d, :]                                # (D, T)
    t = feat[d:d + 1, :]                           # (1, T)

    colp = colp_ref[...]                           # (2D+2L, 1)
    a = colp[0:d, :]
    b_ft = colp[d:2 * d, :]
    lo = colp[2 * d:2 * d + L, :]
    hi = colp[2 * d + L:2 * d + 2 * L, :]

    # FeatureTransform: x_i -> a_i * x_i + b_i (lane-broadcast of (D,1) params).
    xt = x * a + b_ft                              # (D, T)

    # Bucket one-hot from the exact (start, end] compares: (L, T), <=1 hot/lane.
    valid = jnp.logical_and(hi >= t, t > lo)
    onehot = jnp.where(valid, 1.0, 0.0).astype(jnp.float32)

    # Gather per-lane parameters on the (otherwise idle) MXU.  HIGHEST keeps
    # the selected f32 weights exact (one-hot columns are 0/1).
    psel = jnp.dot(table_ref[...], onehot,
                   preferred_element_type=jnp.float32,
                   precision=jax.lax.Precision.HIGHEST)    # (D*D+2D+1, T)

    b1_sel = psel[dd:dd + d, :]                    # (D, T)
    w2_sel = psel[dd + d:dd + 2 * d, :]            # (D, T)
    b2_sel = psel[dd + 2 * d:dd + 2 * d + 1, :]    # (1, T)

    # Single D-wide hidden layer per lane (static unroll over D inputs).
    h = b1_sel
    for i in range(d):
        h = h + psel[i * d:(i + 1) * d, :] * xt[i:i + 1, :]
    h = jnp.maximum(h, LEAKY_SLOPE * h)            # LeakyReLU(0.1), 2 VPU ops

    # Output layer + sublane reduction (XLU).  No-bucket lanes gathered zeros
    # everywhere (incl. b2), so they emit exactly 0, matching the masked sum.
    o_ref[...] = b2_sel + jnp.sum(w2_sel * h, axis=0, keepdims=True)


# --------------------------- packing / wrapper -------------------------------
def _pack_params(params, d):
    """Pack all small parameters into two resident slabs (done once, outside)."""
    f32 = jnp.float32
    L = N_LAYERS

    a = params["ft_a"].astype(f32).reshape(d)
    b_ft = params["ft_b"].astype(f32).reshape(d)
    lo = jnp.asarray(MIN_TIME[:-1], f32)
    hi = jnp.asarray(MIN_TIME[1:], f32)
    colp = jnp.concatenate([a, b_ft, lo, hi]).reshape(2 * d + 2 * L, 1)

    w1 = params["w1"].astype(f32)                       # (L, D, D) = (layer, in, out)
    b1 = params["b1"].astype(f32)                       # (L, D)
    w2 = params["w2"].astype(f32).reshape(L, d)         # (L, D)
    b2 = params["b2"].astype(f32).reshape(L, 1)         # (L, 1)
    table = jnp.concatenate([w1.reshape(L, d * d), b1, w2, b2], axis=1)  # (L, P)
    table = table.T                                     # (P, L) = (D*D+2D+1, 21)
    return colp, table


def edge_mlp_pallas(feat, params, tile_n=TILE_N):
    """feat: (D+1, N) with delta_t as the LAST row. Returns (1, N) f32 costs."""
    dp1, n = feat.shape
    d = dp1 - 1
    p_rows = d * d + 2 * d + 1
    c_rows = 2 * d + 2 * N_LAYERS

    # Don't pad tiny inputs all the way up to TILE_N; keep tiles lane-aligned.
    tile = min(tile_n, _round_up(max(n, 1), 512))
    n_pad = _round_up(n, tile)
    if n_pad != n:
        feat = jnp.pad(feat, ((0, 0), (0, n_pad - n)))  # padded t=0 -> no bucket -> 0

    colp, table = _pack_params(params, d)
    grid = (n_pad // tile,)

    out = pl.pallas_call(
        _edge_mlp_kernel,
        out_shape=jax.ShapeDtypeStruct((1, n_pad), jnp.float32),
        grid_spec=pl.GridSpec(
            grid=grid,
            in_specs=[
                pl.BlockSpec((dp1, tile), lambda i: (0, i)),           # features (tiled)
                pl.BlockSpec((c_rows, 1), lambda i: (0, 0)),           # a/b/lo/hi (resident)
                pl.BlockSpec((p_rows, N_LAYERS), lambda i: (0, 0)),    # gather table (resident)
            ],
            out_specs=pl.BlockSpec((1, tile), lambda i: (0, i)),
        ),
        compiler_params=pltpu.CompilerParams(
            dimension_semantics=("parallel",),
        ),
    )(feat.astype(jnp.float32), colp, table)
    return out[:, :n]


# --------------------------- Classifier wrapper ------------------------------
def classifier_forward(nodes, edges, params, features):
    # Glue (dict plumbing) stays in plain JAX.  Each edge feature is scalar per
    # edge (enforced by the original module's asserts); stack them lane-dense
    # as (D+1, N) with delta_t as the last row.
    rows = [jnp.asarray(edges[key][0]).astype(jnp.float32).reshape(-1)
            for key in features]
    dt_i = features.index("delta_t")
    order = [i for i in range(len(features)) if i != dt_i] + [dt_i]
    feat = jnp.stack([rows[i] for i in order], axis=0)       # (D+1, N)

    edge_costs = edge_mlp_pallas(feat, params)               # (1, N) lane-dense

    node_costs = jnp.ones_like(nodes["conf"])
    inout_var = 0.0 * jnp.ones(1, jnp.float32)
    det = 0.0 * jnp.ones(1, jnp.float32)
    det_costs = -det * node_costs
    inout_costs = inout_var * node_costs

    return {
        "in_costs": inout_costs.astype(jnp.float32),
        "out_costs": inout_costs.astype(jnp.float32),
        "node_costs": det_costs.astype(jnp.float32),
        "edge_sources": edges["source"],
        "edge_sinks": edges["sink"],
        "edge_costs": edge_costs,
        "node_frames": nodes["frame"],
    }


# Pure-JAX reference (mirrors the PyTorch module exactly) for correctness check.
def _edge_mlp_ref(x_without_t, t, params):
    xt = x_without_t * params["ft_a"][None, :] + params["ft_b"][None, :]
    acc = jnp.zeros((x_without_t.shape[0], 1), jnp.float32)
    for layer in range(N_LAYERS):
        h = xt @ params["w1"][layer] + params["b1"][layer]
        h = jnp.where(h >= 0.0, h, LEAKY_SLOPE * h)
        out = h @ params["w2"][layer] + params["b2"][layer]
        valid = jnp.logical_and(MIN_TIME[layer + 1] >= t,
                                t > MIN_TIME[layer]).astype(jnp.float32)
        acc = acc + out * valid
    return acc


if __name__ == "__main__":
    features = ["conf", "iou", "delta_t", "dist"]   # F = 4, D = F-1 = 3
    F = len(features)
    D = F - 1
    n_edges = 16
    n_nodes = 8

    key = jax.random.PRNGKey(0)
    k = jax.random.split(key, 12)

    # Deterministic synthetic parameters (shapes per MLP/FeatureTransform init).
    params = {
        "ft_a": 1.0 + 0.5 * jax.random.normal(k[0], (D,), jnp.float32),
        "ft_b": 0.1 * jax.random.normal(k[1], (D,), jnp.float32),
        # Stored pre-transposed: w1[l] has shape (in, out) = (D, D).
        "w1": 0.3 * jax.random.normal(k[2], (N_LAYERS, D, D), jnp.float32),
        "b1": 0.1 * jax.random.normal(k[3], (N_LAYERS, D), jnp.float32),
        # Stored pre-transposed: w2[l] has shape (in, 1) = (D, 1).
        "w2": 0.3 * jax.random.normal(k[4], (N_LAYERS, D, 1), jnp.float32),
        "b2": 0.1 * jax.random.normal(k[5], (N_LAYERS, 1), jnp.float32),
    }

    # Synthetic graph inputs mirroring the PyTorch dict interface
    # (edges[key] is a tuple whose first element is the feature tensor).
    edges = {
        "conf": (jax.random.uniform(k[6], (n_edges,), jnp.float32),),
        "iou": (jax.random.uniform(k[7], (n_edges,), jnp.float32),),
        "delta_t": (jax.random.uniform(k[8], (n_edges,), jnp.float32,
                                       minval=0.0, maxval=2.2),),
        "dist": (jax.random.normal(k[9], (n_edges,), jnp.float32),),
        "source": jax.random.randint(k[10], (n_edges,), 0, n_nodes),
        "sink": jax.random.randint(k[11], (n_edges,), 0, n_nodes),
    }
    nodes = {
        "conf": jax.random.uniform(jax.random.PRNGKey(1), (n_nodes,),
                                   jnp.float32),
        "frame": jnp.arange(n_nodes, dtype=jnp.int32),
    }

    costs = classifier_forward(nodes, edges, params, features)
    costs = jax.tree_util.tree_map(jax.block_until_ready, costs)

    # Reference check of the kernel hot path (small case).
    x = jnp.stack([edges[f][0] for f in features], axis=1).astype(jnp.float32)
    dt_i = features.index("delta_t")
    inds = [i for i in range(F) if i != dt_i]
    ref = _edge_mlp_ref(x[:, jnp.array(inds)], x[:, dt_i:dt_i + 1], params)
    ref = ref[:, 0][None, :]
    assert costs["edge_costs"].shape == (1, n_edges)
    assert costs["node_costs"].shape == (n_nodes,)
    assert jnp.allclose(costs["edge_costs"], ref, atol=1e-4, rtol=1e-4)

    # Second check: larger N, not a tile multiple (exercises padding + bucket 20).
    n_big = 3000
    kb = jax.random.split(jax.random.PRNGKey(2), 2)
    xb = jax.random.normal(kb[0], (D, n_big), jnp.float32)
    tb = jax.random.uniform(kb[1], (1, n_big), jnp.float32, minval=0.0,
                            maxval=2.5)
    feat_big = jnp.concatenate([xb, tb], axis=0)
    out_big = jax.block_until_ready(edge_mlp_pallas(feat_big, params))
    ref_big = _edge_mlp_ref(xb.T, tb.T, params)[:, 0][None, :]
    assert out_big.shape == (1, n_big)
    assert jnp.allclose(out_big, ref_big, atol=1e-4, rtol=1e-4)

    print("KERNEL_OK")
</pallas_src>

<mosaic_0001>
module attributes {stable_mosaic.version = 11 : i64} {
  func.func @_edge_mlp_kernel(%arg0: i32, %arg1: memref<4x512xf32, #tpu.memory_space<vmem>>, %arg2: memref<48x1xf32, #tpu.memory_space<vmem>>, %arg3: memref<16x21xf32, #tpu.memory_space<vmem>>, %arg4: memref<1x512xf32, #tpu.memory_space<vmem>>) attributes {dimension_semantics = [#tpu.dimension_semantics<parallel>], iteration_bounds = array<i64: 1>, scalar_prefetch = 0 : i64, scratch_operands = 0 : i64, tpu.core_type = #tpu.core_type<tc>, window_params = [{transform_indices = @transform_0, window_bounds = array<i64: 4, 512>}, {pipeline_mode = #tpu.pipeline_mode<synchronous>, transform_indices = @transform_1, window_bounds = array<i64: 48, 1>}, {pipeline_mode = #tpu.pipeline_mode<synchronous>, transform_indices = @transform_2, window_bounds = array<i64: 16, 21>}, {transform_indices = @transform_3, window_bounds = array<i64: 1, 512>}]} {
    %c0 = arith.constant 0 : index
    %c0_0 = arith.constant 0 : index
    %0 = vector.load %arg1[%c0, %c0_0] : memref<4x512xf32, #tpu.memory_space<vmem>>, vector<4x512xf32>
    %1 = vector.extract_strided_slice %0 {offsets = [0, 0], sizes = [3, 512], strides = [1, 1]} : vector<4x512xf32> to vector<3x512xf32>
    %2 = vector.extract_strided_slice %0 {offsets = [3, 0], sizes = [1, 512], strides = [1, 1]} : vector<4x512xf32> to vector<1x512xf32>
    %c0_1 = arith.constant 0 : index
    %c0_2 = arith.constant 0 : index
    %3 = vector.load %arg2[%c0_1, %c0_2] : memref<48x1xf32, #tpu.memory_space<vmem>>, vector<48x1xf32>
    %4 = vector.extract_strided_slice %3 {offsets = [0, 0], sizes = [3, 1], strides = [1, 1]} : vector<48x1xf32> to vector<3x1xf32>
    %5 = vector.extract_strided_slice %3 {offsets = [3, 0], sizes = [3, 1], strides = [1, 1]} : vector<48x1xf32> to vector<3x1xf32>
    %6 = vector.extract_strided_slice %3 {offsets = [6, 0], sizes = [21, 1], strides = [1, 1]} : vector<48x1xf32> to vector<21x1xf32>
    %7 = vector.extract_strided_slice %3 {offsets = [27, 0], sizes = [21, 1], strides = [1, 1]} : vector<48x1xf32> to vector<21x1xf32>
    %8 = vector.broadcast %4 : vector<3x1xf32> to vector<3x512xf32>
    %9 = arith.mulf %1, %8 : vector<3x512xf32>
    %10 = vector.broadcast %5 : vector<3x1xf32> to vector<3x512xf32>
    %11 = arith.addf %9, %10 : vector<3x512xf32>
    %12 = vector.broadcast %7 : vector<21x1xf32> to vector<21x512xf32>
    %13 = vector.broadcast %2 : vector<1x512xf32> to vector<21x512xf32>
    %14 = arith.cmpf oge, %12, %13 : vector<21x512xf32>
    %15 = vector.broadcast %2 : vector<1x512xf32> to vector<21x512xf32>
    %16 = vector.broadcast %6 : vector<21x1xf32> to vector<21x512xf32>
    %17 = arith.cmpf ogt, %15, %16 : vector<21x512xf32>
    %18 = arith.andi %14, %17 : vector<21x512xi1>
    %cst = arith.constant 1.000000e+00 : f32
    %cst_3 = arith.constant 0.000000e+00 : f32
    %19 = vector.broadcast %cst : f32 to vector<21x512xf32>
    %20 = vector.broadcast %cst_3 : f32 to vector<21x512xf32>
    %21 = arith.select %18, %19, %20 : vector<21x512xi1>, vector<21x512xf32>
    %c0_4 = arith.constant 0 : index
    %c0_5 = arith.constant 0 : index
    %22 = vector.load %arg3[%c0_4, %c0_5] : memref<16x21xf32, #tpu.memory_space<vmem>>, vector<16x21xf32>
    %cst_6 = arith.constant dense<0.000000e+00> : vector<16x512xf32>
    %23 = tpu.matmul %22, %21, %cst_6 {dimension_numbers = #tpu.dot_dimension_numbers<[1], [0], [0], [1], [0, 0, 1, 1], [], []>, precision = #tpu.contract_precision<fp32>} : vector<16x21xf32>, vector<21x512xf32>, vector<16x512xf32> -> vector<16x512xf32>
    %24 = vector.extract_strided_slice %23 {offsets = [9, 0], sizes = [3, 512], strides = [1, 1]} : vector<16x512xf32> to vector<3x512xf32>
    %25 = vector.extract_strided_slice %23 {offsets = [12, 0], sizes = [3, 512], strides = [1, 1]} : vector<16x512xf32> to vector<3x512xf32>
    %26 = vector.extract_strided_slice %23 {offsets = [15, 0], sizes = [1, 512], strides = [1, 1]} : vector<16x512xf32> to vector<1x512xf32>
    %27 = vector.extract_strided_slice %23 {offsets = [0, 0], sizes = [3, 512], strides = [1, 1]} : vector<16x512xf32> to vector<3x512xf32>
    %28 = vector.extract_strided_slice %11 {offsets = [0, 0], sizes = [1, 512], strides = [1, 1]} : vector<3x512xf32> to vector<1x512xf32>
    %29 = vector.broadcast %28 : vector<1x512xf32> to vector<3x512xf32>
    %30 = arith.mulf %27, %29 : vector<3x512xf32>
    %31 = arith.addf %24, %30 : vector<3x512xf32>
    %32 = vector.extract_strided_slice %23 {offsets = [3, 0], sizes = [3, 512], strides = [1, 1]} : vector<16x512xf32> to vector<3x512xf32>
    %33 = vector.extract_strided_slice %11 {offsets = [1, 0], sizes = [1, 512], strides = [1, 1]} : vector<3x512xf32> to vector<1x512xf32>
    %34 = vector.broadcast %33 : vector<1x512xf32> to vector<3x512xf32>
    %35 = arith.mulf %32, %34 : vector<3x512xf32>
    %36 = arith.addf %31, %35 : vector<3x512xf32>
    %37 = vector.extract_strided_slice %23 {offsets = [6, 0], sizes = [3, 512], strides = [1, 1]} : vector<16x512xf32> to vector<3x512xf32>
    %38 = vector.extract_strided_slice %11 {offsets = [2, 0], sizes = [1, 512], strides = [1, 1]} : vector<3x512xf32> to vector<1x512xf32>
    %39 = vector.broadcast %38 : vector<1x512xf32> to vector<3x512xf32>
    %40 = arith.mulf %37, %39 : vector<3x512xf32>
    %41 = arith.addf %36, %40 : vector<3x512xf32>
    %cst_7 = arith.constant 1.000000e-01 : f32
    %42 = vector.broadcast %cst_7 : f32 to vector<3x512xf32>
    %43 = arith.mulf %42, %41 : vector<3x512xf32>
    %44 = arith.maximumf %41, %43 : vector<3x512xf32>
    %45 = arith.mulf %25, %44 : vector<3x512xf32>
    %cst_8 = arith.constant dense<0.000000e+00> : vector<512xf32>
    %46 = vector.multi_reduction <add>, %45, %cst_8 [0] : vector<3x512xf32> to vector<512xf32>
    %47 = vector.shape_cast %46 : vector<512xf32> to vector<1x512xf32>
    %48 = arith.addf %26, %47 : vector<1x512xf32>
    %c0_9 = arith.constant 0 : index
    %c0_10 = arith.constant 0 : index
    %49 = vector.load %arg4[%c0_9, %c0_10] : memref<1x512xf32, #tpu.memory_space<vmem>>, vector<1x512xf32>
    tpu.vector_store %arg4[%c0_9, %c0_10], %48 {strides = array<i32>} : memref<1x512xf32, #tpu.memory_space<vmem>>, vector<1x512xf32>,
    return
  }
  func.func @transform_0(%arg0: i32) -> (i32, i32) {
    %c0_i32 = arith.constant 0 : i32
    %c0_i32_0 = arith.constant 0 : i32
    return %c0_i32, %arg0 : i32, i32
  }
  func.func @transform_1(%arg0: i32) -> (i32, i32) {
    %c0_i32 = arith.constant 0 : i32
    %c0_i32_0 = arith.constant 0 : i32
    %c0_i32_1 = arith.constant 0 : i32
    return %c0_i32, %c0_i32_0 : i32, i32
  }
  func.func @transform_2(%arg0: i32) -> (i32, i32) {
    %c0_i32 = arith.constant 0 : i32
    %c0_i32_0 = arith.constant 0 : i32
    %c0_i32_1 = arith.constant 0 : i32
    return %c0_i32, %c0_i32_0 : i32, i32
  }
  func.func @transform_3(%arg0: i32) -> (i32, i32) {
    %c0_i32 = arith.constant 0 : i32
    %c0_i32_0 = arith.constant 0 : i32
    return %c0_i32, %arg0 : i32, i32
  }
}

</mosaic_0001>

<bundles_post_ra>
// kernel: tpu_custom_call.1
= control target key start
LH: loop header
LB: loop body
LE: loop exit
PB: predicated region body
PF: predicated region fallthrough
CT: control target
= control target key end

     0   :  { %v1841_v2 = vmov 0   ;;  %s2393_s0 = inlined_call_operand.vmem [shape: f32[4,512], index: 0, kind: input, shape index: {}]   ;;  %s2394_s1 = inlined_call_operand.vmem [shape: f32[48,1], index: 1, kind: input, shape index: {}]   ;;  %s2395_s2 = inlined_call_operand.vmem [shape: f32[16,21], index: 2, kind: input, shape index: {}]   ;;  %s2396_s3 = inlined_call_operand.hbm [shape: f32[1,512], index: 3, kind: output, shape index: {}]  }
   0x1   :  { %v18_v0 = vld [vmem:[%s2394_s1 + $0x8] sm:$0xff]  ;;  %v17_v1 = vld [vmem:[%s2394_s1] sm:$0xff]  ;;  %1816 = vset.pattern.permute.xlu1 %v1841_v2  ;;  %1815 = vset.pattern.permute.xlu0 %v1841_v2 }
   0x2   :  { %122 = vperm.xlu1 %1816, %v18_v0   ;;  %25 = vperm.xlu0 %1815, %v17_v1  }
   0x3   :  { %8 = vsyncpa [#allocation3], 0  ;;  %v19_v3 = vld [vmem:[%s2394_s1 + $0x10] sm:$0xff]  ;;  %v20_v4 = vld [vmem:[%s2394_s1 + $0x18] sm:$0xff]  ;;  %v1842_v7 = vmov 0.0   ;;  %v30_v8 = vlaneseq  ;;  %vm269_vm0 = vcmask 171008  }
   0x4   :  { %v22_v5 = vld [vmem:[%s2394_s1 + $0x28] sm:$0xff]  ;;  %v21_v6 = vld [vmem:[%s2394_s1 + $0x20] sm:$0xff]  ;;  %354 = vmatprep.mubr.f32.mxu0 %v1842_v7  ;;  %920 = vmatprep.mubr.f32.mxu1 %v1842_v7  ;;  %vm162_vm10 = vcmask 1044480  }
   0x5   :  { %v227_v9 = vld [vmem:[%s2395_s2] sm:$0xff]  ;;  %v228_v10 = vld [vmem:[%s2395_s2 + $0x8] sm:$0xff]  ;;  %v1896_v11 = vshrl.u32 %v30_v8, 7 }
   0x6   :  { %127 = vperm.xlu1 %1816, %v19_v3   ;;  %56 = vperm.xlu0 %1815, %v20_v4   ;;  %v271_v12 = vsel %vm269_vm0, %v227_v9, 0  ;;  %v274_v13 = vsel %vm269_vm0, %v228_v10, 0  ;;  %v1903_v16 = vld [vmem:[%s2393_s0] sm:$0xff]  ;;  %v1908_v17 = vld [vmem:[%s2393_s0 + $0x8] sm:$0xff]  ;;  %s1846_s0 = smov [#allocation2]  }
   0x7   :  { %v73_v14 = vsub.s32 3, %v1896_v11  ;;  %v77_v15 = vsub.s32 7, %v1896_v11  ;;  %v1910_v18 = vand.u32 4294901760, %v271_v12  ;;  %v1912_v19 = vand.u32 4294901760, %v274_v13  ;;  %s1712_s2 = sshll.u32 %s1846_s0, 4  ;;  %s1713_s2 = int_to_ptr.vmem [resolvable:$true] %s1712_s2 }
   0x8   :  { %s1817_s4 = scalar_lea.vmem %s1713_s2, 64  ;;  %p1822_p1 = scmp.lt.s32.totalorder %s1713_s2, %s1713_s2 }
   0x9   :  { %v74_v20 = vrot.slane %v1903_v16, %v73_v14  ;;  %v78_v21 = vrot.slane %v1903_v16, %v77_v15  ;;  %v82_v22 = vrot.slane %v1908_v17, %v73_v14  ;;  %v86_v23 = vrot.slane %v1908_v17, %v77_v15  ;;  %p1818_p0 = scmp.ne.s32.totalorder %s1713_s2, %s1817_s4  ;;  %p1823_p2 = scmp.lt.s32.totalorder %s1817_s4, %s1817_s4 }
   0xa   :  { %66 = vperm.xlu1 %1816, %v22_v5   ;;  %61 = vperm.xlu0 %1815, %v21_v6   ;;  %v1919_v24 = vsub.f32 %v271_v12, %v1910_v18  ;;  %v1922_v25 = vsub.f32 %v274_v13, %v1912_v19 }
   0xb   :  { %v1924_v26 = vrot.slane %v74_v20, %v73_v14  ;;  %v1926_v27 = vrot.slane %v78_v21, %v73_v14  ;;  %v1928_v28 = vrot.slane %v82_v22, %v73_v14  ;;  %v1930_v29 = vrot.slane %v86_v23, %v73_v14  ;;  %p1824_p3 = por %p1823_p2, %p1822_p1 }
   0xc   :  { %v1933_v30 = vand.u32 4294901760, %v1919_v24  ;;  %v1936_v31 = vand.u32 4294901760, %v1922_v25 }
   0xd   :  { %p1825_p4 = pnand %p1824_p3, %p1818_p0 }
   0xe   :  { %v358_v34 = vsub.f32 %v1919_v24, %v1933_v30  ;;  %v369_v35 = vsub.f32 %v1922_v25, %v1936_v31 }
  0x10   :  { %v1975_v44 = vand.u32 4294901760, %v358_v34  ;;  %v1977_v45 = vand.u32 4294901760, %v369_v35 }
  0x81   :  { %v123_v32 = vpop.permute.xlu1 %122  ;;  %v1942_v33 = vpop.permute.xlu0 %25 }
  0x82   :  { %vm134_vm1 = vcmp.gt.f32.partialorder %v1924_v26, %v123_v32  ;;  %vm135_vm2 = vcmp.gt.f32.partialorder %v1926_v27, %v123_v32  ;;  %vm136_vm3 = vcmp.gt.f32.partialorder %v1928_v28, %v123_v32  ;;  %vm137_vm4 = vcmp.gt.f32.partialorder %v1930_v29, %v123_v32 }
  0x83   :  { %v1949_v36 = vsel %vm134_vm1, 1, %v1841_v2  ;;  %v1952_v37 = vsel %vm135_vm2, 1, %v1841_v2  ;;  %v1955_v38 = vsel %vm136_vm3, 1, %v1841_v2  ;;  %v1958_v39 = vsel %vm137_vm4, 1, %v1841_v2 }
  0x84   :  { %vm130_vm5 = vcmp.gt.f32.partialorder %v1924_v26, %v1942_v33  ;;  %vm131_vm6 = vcmp.gt.f32.partialorder %v1926_v27, %v1942_v33  ;;  %vm132_vm7 = vcmp.gt.f32.partialorder %v1928_v28, %v1942_v33  ;;  %vm133_vm8 = vcmp.gt.f32.partialorder %v1930_v29, %v1942_v33 }
  0x85   :  { %v128_v40 = vpop.permute.xlu1 %127  ;;  %v1969_v41 = vsel %vm130_vm5, 1, %v1841_v2  ;;  %v1972_v42 = vsel %vm131_vm6, 1, %v1841_v2  ;;  %v164_v43 = vrot.slane %v1949_v36, 3  ;;  %v167_v46 = vrot.slane %v1952_v37, 3  ;;  %v1987_v50 = vpop.permute.xlu0 %56 }
  0x86   :  { %v170_v47 = vrot.slane %v1955_v38, 3  ;;  %v1982_v48 = vsel %vm132_vm7, 1, %v1841_v2  ;;  %v1985_v49 = vsel %vm133_vm8, 1, %v1841_v2  ;;  %v173_v51 = vrot.slane %v1958_v39, 3 }
  0x87   :  { %v163_v52 = vrot.slane %v1969_v41, 3  ;;  %v166_v53 = vrot.slane %v1972_v42, 3  ;;  %vm138_vm9 = vcmp.gt.f32.partialorder %v1924_v26, %v128_v40  ;;  %v169_v54 = vrot.slane %v1982_v48, 3 }
  0x88   :  { %v172_v55 = vrot.slane %v1985_v49, 3  ;;  %vm139_vm11 = vcmp.gt.f32.partialorder %v1926_v27, %v128_v40  ;;  %vm140_vm12 = vcmp.gt.f32.partialorder %v1928_v28, %v128_v40  ;;  %vm141_vm13 = vcmp.gt.f32.partialorder %v1930_v29, %v128_v40 }
  0x89   :  { %v67_v56 = vpop.permute.xlu1 %66  ;;  %v154_v57 = vsel %vm138_vm9, 1, %v1841_v2  ;;  %v155_v58 = vsel %vm139_vm11, 1, %v1841_v2  ;;  %v156_v59 = vsel %vm140_vm12, 1, %v1841_v2  ;;  %v157_v60 = vsel %vm141_vm13, 1, %v1841_v2  ;;  %v62_v1 = vpop.permute.xlu0 %61 }
  0x8a   :  { %v175_v61 = vrot.slane %v154_v57, 3  ;;  %v177_v62 = vrot.slane %v155_v58, 3  ;;  %v179_v63 = vrot.slane %v156_v59, 3  ;;  %v181_v0 = vrot.slane %v157_v60, 3 }
  0x8b   :  { %vm115_vm14 = vcmp.ge.f32.partialorder %v67_v56, %v1924_v26  ;;  %vm116_vm15 = vcmp.ge.f32.partialorder %v67_v56, %v1926_v27  ;;  %vm117_vm0 = vcmp.ge.f32.partialorder %v67_v56, %v1928_v28  ;;  %vm118_vm1 = vcmp.ge.f32.partialorder %v67_v56, %v1930_v29 }
  0x8c   :  { %vm142_vm2 = vcmp.gt.f32.partialorder %v1924_v26, %v1987_v50  ;;  %vm143_vm3 = vcmp.gt.f32.partialorder %v1926_v27, %v1987_v50  ;;  %vm144_vm4 = vcmp.gt.f32.partialorder %v1928_v28, %v1987_v50  ;;  %vm145_vm5 = vcmp.gt.f32.partialorder %v1930_v29, %v1987_v50 }
  0x8d   :  { %v158_v3 = vsel %vm142_vm2, 1, %v1841_v2  ;;  %v159_v4 = vsel %vm143_vm3, 1, %v1841_v2  ;;  %v160_v5 = vsel %vm144_vm4, 1, %v1841_v2  ;;  %v161_v6 = vsel %vm145_vm5, 1, %v1841_v2 }
  0x8e   :  { %v183_v9 = vrot.slane %v158_v3, 3  ;;  %v185_v10 = vrot.slane %v159_v4, 3  ;;  %v187_v12 = vrot.slane %v160_v5, 3  ;;  %v189_v13 = vrot.slane %v161_v6, 3 }
  0x8f   :  { %vm111_vm6 = vcmp.ge.f32.partialorder %v62_v1, %v1924_v26  ;;  %vm112_vm7 = vcmp.ge.f32.partialorder %v62_v1, %v1926_v27  ;;  %v176_v21 = vsel %vm162_vm10, %v164_v43, %v175_v61  ;;  %v178_v22 = vsel %vm162_vm10, %v167_v46, %v177_v62 }
  0x90   :  { %v184_v14 = vsel %vm162_vm10, %v175_v61, %v183_v9  ;;  %v186_v15 = vsel %vm162_vm10, %v177_v62, %v185_v10  ;;  %v188_v20 = vsel %vm162_vm10, %v179_v63, %v187_v12  ;;  %v190_v2 = vsel %vm162_vm10, %v181_v0, %v189_v13 }
  0x91   :  { %vm199_vm11 = vcmp.ne.s32.totalorder %v184_v14, 0  ;;  %vm200_vm12 = vcmp.ne.s32.totalorder %v186_v15, 0  ;;  %vm201_vm13 = vcmp.ne.s32.totalorder %v188_v20, 0  ;;  %vm202_vm2 = vcmp.ne.s32.totalorder %v190_v2, 0 }
  0x92   :  { %vm211_vm3 = vmand %vm115_vm14, %vm199_vm11  ;;  %v180_v23 = vsel %vm162_vm10, %v170_v47, %v179_v63  ;;  %v182_v34 = vsel %vm162_vm10, %v173_v51, %v181_v0  ;;  %vm195_vm14 = vcmp.ne.s32.totalorder %v176_v21, 0  ;;  %vm196_vm5 = vcmp.ne.s32.totalorder %v178_v22, 0 }
  0x93   :  { %vm212_vm4 = vmand %vm116_vm15, %vm200_vm12  ;;  %v223_v32 = vsel %vm211_vm3, 1.0, %v1842_v7  ;;  %vm197_vm9 = vcmp.ne.s32.totalorder %v180_v23, 0  ;;  %vm198_vm8 = vcmp.ne.s32.totalorder %v182_v34, 0  ;;  %vm108_vm12 = vcmp.ge.f32.partialorder %v1987_v50, %v1926_v27 }
  0x94   :  { %vm213_vm11 = vmand %vm117_vm0, %vm201_vm13  ;;  %v224_v35 = vsel %vm212_vm4, 1.0, %v1842_v7  ;;  %v253_v40 = vrot.slane %v223_v32, 3  ;;  %v168_v59 = vsel %vm162_vm10, %v166_v53, %v167_v46  ;;  %v174_v0 = vsel %vm162_vm10, %v172_v55, %v173_v51 }
  0x95   :  { %vm214_vm15 = vmand %vm118_vm1, %vm202_vm2  ;;  %v2050_v57 = vsel %vm213_vm11, 1.0, %v1842_v7  ;;  %v255_v58 = vrot.slane %v224_v35, 3  ;;  %vm192_vm1 = vcmp.ne.s32.totalorder %v168_v59, 0  ;;  %vm110_vm2 = vcmp.ge.f32.partialorder %v1987_v50, %v1930_v29 }
  0x96   :  { %v226_v60 = vsel %vm214_vm15, 1.0, %v1842_v7  ;;  %v257_v61 = vrot.slane %v2050_v57, 3  ;;  %v2062_v56 = vsel %vm162_vm10, %v253_v40, 0  ;;  %vm207_vm0 = vmand %vm111_vm6, %vm195_vm14  ;;  %vm2397_vm6 = vcmp.ge.f32.partialorder %v62_v1, %v1928_v28 }
  0x97   :  { %v259_v62 = vrot.slane %v226_v60, 3  ;;  %v2068_v63 = vsel %vm162_vm10, %v255_v58, 0  ;;  %vm208_vm13 = vmand %vm112_vm7, %vm196_vm5  ;;  %v219_v37 = vsel %vm207_vm0, 1.0, %v1842_v7  ;;  %vm2398_vm7 = vcmp.ge.f32.partialorder %v62_v1, %v1930_v29 }
  0x98   :  { %v2077_v42 = vsel %vm162_vm10, %v257_v61, 0  ;;  %vm209_vm3 = vmand %vm2397_vm6, %vm197_vm9  ;;  %v220_v46 = vsel %vm208_vm13, 1.0, %v1842_v7  ;;  %v242_v53 = vrot.slane %v219_v37, 3  ;;  %vm194_vm9 = vcmp.ne.s32.totalorder %v174_v0, 0 }
  0x99   :  { %v2089_v3 = vsel %vm162_vm10, %v259_v62, 0  ;;  %vm210_vm4 = vmand %vm2398_vm7, %vm198_vm8  ;;  %v221_v4 = vsel %vm209_vm3, 1.0, %v1842_v7  ;;  %v245_v5 = vrot.slane %v220_v46, 3  ;;  %vm107_vm5 = vcmp.ge.f32.partialorder %v1987_v50, %v1924_v26 }
  0x9a   :  { %v222_v6 = vsel %vm210_vm4, 1.0, %v1842_v7  ;;  %v248_v9 = vrot.slane %v221_v4, 3  ;;  %vm204_vm14 = vmand %vm108_vm12, %vm192_vm1  ;;  %v165_v39 = vsel %vm162_vm10, %v163_v52, %v164_v43  ;;  %v254_v36 = vsel %vm162_vm10, %v242_v53, %v253_v40 }
  0x9b   :  { %v251_v49 = vrot.slane %v222_v6, 3  ;;  %v216_v51 = vsel %vm204_vm14, 1.0, %v1842_v7  ;;  %v256_v55 = vsel %vm162_vm10, %v245_v5, %v255_v58  ;;  %vm206_vm8 = vmand %vm110_vm2, %vm194_vm9  ;;  %vm191_vm11 = vcmp.ne.s32.totalorder %v165_v39, 0 }
  0x9c   :  { %v244_v27 = vrot.slane %v216_v51, 3  ;;  %v288_v1 = vand.u32 4294901760, %v256_v55  ;;  %v218_v26 = vsel %vm206_vm8, 1.0, %v1842_v7  ;;  %vm203_vm15 = vmand %vm107_vm5, %vm191_vm11  ;;  %v290_v10 = vand.u32 4294901760, %v254_v36 }
  0x9d   :  { %v250_v41 = vrot.slane %v218_v26, 3  ;;  %v260_v43 = vsel %vm162_vm10, %v251_v49, %v259_v62  ;;  %v215_v52 = vsel %vm203_vm15, 1.0, %v1842_v7  ;;  %vm109_vm12 = vcmp.ge.f32.partialorder %v1987_v50, %v1928_v28 }
  0x9e   :  { %v246_v12 = vsel %vm162_vm10, %v244_v27, %v245_v5  ;;  %v2117_v13 = vsub.f32 %v256_v55, %v288_v1  ;;  %v854_v29 = vand.u32 4294901760, %v260_v43  ;;  %v241_v14 = vrot.slane %v215_v52, 3 }
  0x9f   :  { %v284_v15 = vand.u32 4294901760, %v246_v12  ;;  %v252_v20 = vsel %vm162_vm10, %v250_v41, %v251_v49  ;;  %v2120_v2 = vsub.f32 %v254_v36, %v290_v10  ;;  %v171_v32 = vsel %vm162_vm10, %v169_v54, %v170_v47 }
  0xa0   :  { %v850_v21 = vand.u32 4294901760, %v252_v20  ;;  %v2124_v22 = vsub.f32 %v260_v43, %v854_v29  ;;  %v243_v23 = vsel %vm162_vm10, %v241_v14, %v242_v53  ;;  %vm193_vm0 = vcmp.ne.s32.totalorder %v171_v32, 0 }
  0xa1   :  { %v2132_v34 = vpack.c.bf16 %v288_v1, %v284_v15  ;;  %v2134_v35 = vsub.f32 %v246_v12, %v284_v15  ;;  %v286_v40 = vand.u32 4294901760, %v243_v23  ;;  %vm205_vm1 = vmand %vm109_vm12, %vm193_vm0  ;;  %v258_v50 = vsel %vm162_vm10, %v248_v9, %v257_v61 }
  0xa2   :  { %v2136_v57 = vpack.c.bf16 %v854_v29, %v850_v21  ;;  %v2138_v28 = vsub.f32 %v252_v20, %v850_v21  ;;  %v2142_v58 = vand.u32 4294901760, %v2068_v63  ;;  %v217_v48 = vsel %vm205_vm1, 1.0, %v1842_v7 }
  0xa3   :  { %1722 = vmatprep.subr.bf16.mxu0 %v2132_v34  ;;  %v2145_v38 = vpack.c.bf16 %v290_v10, %v286_v40  ;;  %v2147_v47 = vsub.f32 %v243_v23, %v286_v40  ;;  %v856_v54 = vand.u32 4294901760, %v258_v50  ;;  %v247_v59 = vrot.slane %v217_v48, 3 }
  0xa4   :  { %1746 = vmatprep.subr.bf16.mxu1 %v2136_v57  ;;  %v2152_v60 = vand.u32 4294901760, %v2089_v3  ;;  %v2155_v61 = vand.u32 4294901760, %v2062_v56  ;;  %v2158_v62 = vand.u32 4294901760, %v2077_v42  ;;  %v379_v46 = vand.u32 4294901760, %v2134_v35 }
  0xa5   :  { %1724 = vmatpush1.bf16.msra.mxu0 %v2145_v38  ;;  %v2161_v37 = vsub.f32 %v258_v50, %v856_v54  ;;  %v391_v53 = vand.u32 4294901760, %v2117_v13  ;;  %v945_v0 = vand.u32 4294901760, %v2138_v28  ;;  %v249_v4 = vsel %vm162_vm10, %v247_v59, %v248_v9 }
  0xa6   :  { %293 = vmatprep.subr.mxu0 %v2142_v58  ;;  %v957_v5 = vand.u32 4294901760, %v2124_v22  ;;  %v385_v6 = vand.u32 4294901760, %v2147_v47  ;;  %v397_v39 = vand.u32 4294901760, %v2120_v2  ;;  %v852_v49 = vand.u32 4294901760, %v249_v4 }
  0xa7   :  { %v380_v51 = vsub.f32 %v2134_v35, %v379_v46  ;;  %v392_v55 = vsub.f32 %v2117_v13, %v391_v53  ;;  %v946_v9 = vsub.f32 %v2138_v28, %v945_v0  ;;  %v963_v36 = vand.u32 4294901760, %v2161_v37 }
  0xa8   :  { %v958_v27 = vsub.f32 %v2124_v22, %v957_v5  ;;  %v386_v1 = vsub.f32 %v2147_v47, %v385_v6  ;;  %v398_v26 = vsub.f32 %v2120_v2, %v397_v39  ;;  %v2190_v41 = vpack.c.bf16 %v856_v54, %v852_v49 }
  0xa9   :  { %v2192_v43 = vsub.f32 %v249_v4, %v852_v49  ;;  %295 = vmatpush1.msra.mxu0 %v2155_v61  ;;  %v381_v52 = vand.u32 4294901760, %v380_v51  ;;  %v393_v10 = vand.u32 4294901760, %v392_v55  ;;  %v947_v12 = vand.u32 4294901760, %v946_v9 }
  0xaa   :  { %360 = vmatmul.mubr.f32.vlgmr.msra.gmra.mrb[0].mxu0 %v1975_v44  ;;  %v959_v29 = vand.u32 4294901760, %v958_v27  ;;  %v387_v14 = vand.u32 4294901760, %v386_v1  ;;  %v399_v15 = vand.u32 4294901760, %v398_v26  ;;  %1748 = vmatpush1.bf16.msra.mxu1 %v2190_v41  ;;  %v964_v23 = vsub.f32 %v2161_v37, %v963_v36 }
  0xab   :  { %v1725_v20 = vpack.c.bf16 %v393_v10, %v381_v52  ;;  %365 = vmatprep.mubr.f32.mxu0 %v1842_v7  ;;  %v951_v21 = vand.u32 4294901760, %v2192_v43  ;;  %v2204_v32 = vsub.f32 %v2068_v63, %v2142_v58  ;;  %859 = vmatprep.subr.mxu1 %v2152_v60  ;;  %v2209_v48 = vsub.f32 %v2089_v3, %v2152_v60 }
  0xac   :  { %v1749_v40 = vpack.c.bf16 %v959_v29, %v947_v12  ;;  %v1727_v50 = vpack.c.bf16 %v399_v15, %v387_v14  ;;  %v2213_v54 = vsub.f32 %v2062_v56, %v2155_v61  ;;  %v965_v4 = vand.u32 4294901760, %v964_v23 }
  0xad   :  { %1726 = vmatprep.subr.bf16.mxu0 %v1725_v20  ;;  %v952_v59 = vsub.f32 %v2192_v43, %v951_v21  ;;  %v403_v63 = vand.u32 4294901760, %v2204_v32  ;;  %v2221_v49 = vsub.f32 %v2077_v42, %v2158_v62  ;;  %v969_v3 = vand.u32 4294901760, %v2209_v48 }
  0xae   :  { %1728 = vmatpush1.bf16.msra.mxu0 %v1727_v50  ;;  %v409_v51 = vand.u32 4294901760, %v2213_v54  ;;  %861 = vmatpush1.msra.mxu1 %v2158_v62  ;;  %v1729_v12 = vpack.c.bf16 %v2117_v13, %v2134_v35  ;;  %v1731_v14 = vpack.c.bf16 %v2120_v2, %v2147_v47  ;;  %v1753_v15 = vpack.c.bf16 %v2124_v22, %v2138_v28 }
  0xaf   :  { %v953_v56 = vand.u32 4294901760, %v952_v59  ;;  %371 = vmatmul.mubr.f32.gmra.mrb[2].mxu0 %v1977_v45  ;;  %v404_v55 = vsub.f32 %v2204_v32, %v403_v63  ;;  %v975_v9 = vand.u32 4294901760, %v2221_v49  ;;  %926 = vmatmul.mubr.f32.vlgmr.msra.gmra.mrb[0].mxu1 %v1975_v44  ;;  %v970_v42 = vsub.f32 %v2209_v48, %v969_v3 }
  0xb0   :  { %1750 = vmatprep.subr.bf16.mxu1 %v1749_v40  ;;  %v410_v27 = vsub.f32 %v2213_v54, %v409_v51  ;;  %931 = vmatprep.mubr.f32.mxu1 %v1842_v7  ;;  %v1737_v20 = vpack.c.bf16 %v391_v53, %v379_v46  ;;  %v1739_v13 = vpack.c.bf16 %v397_v39, %v385_v6  ;;  %v1844_v2 = vmov 1985246804  }
  0xb1   :  { %v1751_v1 = vpack.c.bf16 %v965_v4, %v953_v56  ;;  %v405_v26 = vand.u32 4294901760, %v404_v55  ;;  %471 = vmatprep.mubr.f32.mxu0 %v1842_v7  ;;  %v976_v52 = vsub.f32 %v2221_v49, %v975_v9  ;;  %v971_v44 = vand.u32 4294901760, %v970_v42 }
  0xb2   :  { %v411_v10 = vand.u32 4294901760, %v410_v27  ;;  %v38_v22 = vunpack.c.l.s4 %v1844_v2  ;;  %vm44_vm10 = vcmask 1040384   ;;  %vm45_vm13 = vcmask 1044484  }
  0xb3   :  { %1752 = vmatpush1.bf16.msra.mxu1 %v1751_v1  ;;  %406 = vmatprep.subr.mxu0 %v405_v26  ;;  %v977_v29 = vand.u32 4294901760, %v976_v52  ;;  %vm46_vm2 = vmor %vm44_vm10, %vm45_vm13  ;;  %v1532_v46 = vsub.s32 2, %v1896_v11  ;;  %vm1582_vm6 = vcmask 1042432   ;;  %vm1703_vm3 = vcmp.lt.s32.totalorder %v30_v8, 512 }
  0xb4   :  { %937 = vmatmul.mubr.f32.gmra.mrb[2].mxu1 %v1977_v45  ;;  %972 = vmatprep.subr.mxu1 %v971_v44  ;;  %v1755_v45 = vpack.c.bf16 %v2161_v37, %v2192_v43  ;;  %v39_v35 = vunpack.c.0.s8 %v38_v22  ;;  %v1476_v37 = vsub.s32 1, %v1896_v11 }
  0xb5   :  { %412 = vmatpush1.msra.mxu0 %v411_v10  ;;  %1037 = vmatprep.mubr.f32.mxu1 %v1842_v7 }
  0xb6   :  { %473 = vmatmul.mubr.f32.vlgmr.msra.gmra.mrb[0].mxu0 %v1910_v18  ;;  %1730 = vmatprep.subr.bf16.mxu0 %v1729_v12  ;;  %v42_v28 = vsub.s32 %v39_v35, %v1896_v11 }
  0xb7   :  { %978 = vmatpush1.msra.mxu1 %v977_v29  ;;  %1732 = vmatpush1.bf16.msra.mxu0 %v1731_v14 }
  0xb8   :  { %1039 = vmatmul.mubr.f32.vlgmr.msra.gmra.mrb[0].mxu1 %v1910_v18  ;;  %1754 = vmatprep.subr.bf16.mxu1 %v1753_v15 }
  0xb9   :  { %1756 = vmatpush1.bf16.msra.mxu1 %v1755_v45  ;;  %500 = vmatprep.subr.mxu0 %v2204_v32 }
  0xba   :  { %1066 = vmatprep.subr.mxu1 %v2209_v48  ;;  %478 = vmatprep.mubr.f32.mxu0 %v1842_v7 }
  0xbb   :  { %1044 = vmatprep.mubr.f32.mxu1 %v1842_v7  ;;  %480 = vmatmul.mubr.f32.gmra.mrb[2].mxu0 %v1912_v19 }
  0xbc   :  { %1046 = vmatmul.mubr.f32.gmra.mrb[2].mxu1 %v1912_v19  ;;  %503 = vmatpush1.msra.mxu0 %v2213_v54 }
  0xbd   :  { %1069 = vmatpush1.msra.mxu1 %v2221_v49  ;;  %1734 = vmatprep.subr.bf16.mxu0 %v2132_v34 }
  0xbe   :  { %1758 = vmatprep.subr.bf16.mxu1 %v2136_v57  ;;  %562 = vmatprep.mubr.f32.mxu0 %v1842_v7 }
  0xbf   :  { %1128 = vmatprep.mubr.f32.mxu1 %v1842_v7  ;;  %565 = vmatmul.mubr.f32.vlgmr.msra.gmra.mrb[0].mxu0 %v1919_v24 }
  0xc0   :  { %1736 = vmatpush1.bf16.msra.mxu0 %v2145_v38  ;;  %1131 = vmatmul.mubr.f32.vlgmr.msra.gmra.mrb[0].mxu1 %v1919_v24  ;;  %v1761_v24 = vpack.c.bf16 %v957_v5, %v945_v0  ;;  %v1480_v0 = vsub.s32 5, %v1896_v11  ;;  %v1536_v5 = vsub.s32 6, %v1896_v11 }
  0xc1   :  { %1760 = vmatpush1.bf16.msra.mxu1 %v2190_v41  ;;  %588 = vmatprep.subr.mxu0 %v2142_v58 }
  0xc2   :  { %1154 = vmatprep.subr.mxu1 %v2152_v60  ;;  %570 = vmatprep.mubr.f32.mxu0 %v1842_v7 }
  0xc3   :  { %1136 = vmatprep.mubr.f32.mxu1 %v1842_v7  ;;  %573 = vmatmul.mubr.f32.gmra.mrb[2].mxu0 %v1922_v25 }
  0xc4   :  { %590 = vmatpush1.msra.mxu0 %v2155_v61  ;;  %1139 = vmatmul.mubr.f32.gmra.mrb[2].mxu1 %v1922_v25  ;;  %v1763_v25 = vpack.c.bf16 %v963_v36, %v951_v21 }
  0xc5   :  { %1156 = vmatpush1.msra.mxu1 %v2158_v62  ;;  %1738 = vmatprep.subr.bf16.mxu0 %v1737_v20 }
  0xc6   :  { %1762 = vmatprep.subr.bf16.mxu1 %v1761_v24  ;;  %649 = vmatprep.mubr.f32.mxu0 %v1842_v7 }
  0xc7   :  { %1215 = vmatprep.mubr.f32.mxu1 %v1842_v7  ;;  %653 = vmatmul.mubr.f32.vlgmr.msra.gmra.mrb[0].mxu0 %v1933_v30 }
  0xc8   :  { %1740 = vmatpush1.bf16.msra.mxu0 %v1739_v13  ;;  %1219 = vmatmul.mubr.f32.vlgmr.msra.gmra.mrb[0].mxu1 %v1933_v30  ;;  %v1843_v30 = vmov 839922192  }
  0xc9   :  { %1764 = vmatpush1.bf16.msra.mxu1 %v1763_v25  ;;  %687 = vmatprep.subr.mxu0 %v403_v63 }
  0xca   :  { %1253 = vmatprep.subr.mxu1 %v969_v3  ;;  %658 = vmatprep.mubr.f32.mxu0 %v1842_v7 }
  0xcb   :  { %1224 = vmatprep.mubr.f32.mxu1 %v1842_v7  ;;  %662 = vmatmul.mubr.f32.gmra.mrb[2].mxu0 %v1936_v31 }
  0xcc   :  { %691 = vmatpush1.msra.mxu0 %v409_v51  ;;  %1228 = vmatmul.mubr.f32.gmra.mrb[2].mxu1 %v1936_v31  ;;  %v28_v31 = vunpack.c.l.s4 %v1843_v30 }
  0xcd   :  { %1257 = vmatpush1.msra.mxu1 %v975_v9  ;;  %1742 = vmatprep.subr.bf16.mxu0 %v2132_v34 }
  0xce   :  { %1766 = vmatprep.subr.bf16.mxu1 %v2136_v57  ;;  %750 = vmatprep.mubr.f32.mxu0 %v1842_v7  ;;  %v29_v34 = vunpack.c.0.s8 %v28_v31 }
  0xcf   :  { %1316 = vmatprep.mubr.f32.mxu1 %v1842_v7  ;;  %752 = vmatmul.mubr.f32.vlgmr.msra.gmra.mrb[0].mxu0 %v1910_v18 }
  0xd0   :  { %1744 = vmatpush1.bf16.msra.mxu0 %v2145_v38  ;;  %1318 = vmatmul.mubr.f32.vlgmr.msra.gmra.mrb[0].mxu1 %v1910_v18  ;;  %v32_v57 = vsub.s32 %v29_v34, %v1896_v11 }
  0xd1   :  { %1768 = vmatpush1.bf16.msra.mxu1 %v2190_v41  ;;  %774 = vmatprep.subr.mxu0 %v2142_v58  ;;  %v43_v58 = vrot.slane %v1942_v33, %v42_v28 }
  0xd2   :  { %1340 = vmatprep.subr.mxu1 %v2152_v60  ;;  %757 = vmatprep.mubr.f32.mxu0 %v1842_v7 }
  0xd3   :  { %1323 = vmatprep.mubr.f32.mxu1 %v1842_v7  ;;  %759 = vmatmul.mubr.f32.gmra.mrb[2].mxu0 %v1912_v19  ;;  %v49_v38 = vrot.slane %v43_v58, 7 }
  0xd4   :  { %776 = vmatpush1.msra.mxu0 %v2155_v61  ;;  %1325 = vmatmul.mubr.f32.gmra.mrb[2].mxu1 %v1912_v19 }
  0xd5   :  { %1342 = vmatpush1.msra.mxu1 %v2158_v62  ;;  %835 = vmatprep.mubr.f32.mxu0 %v1842_v7  ;;  %v1420_v62 = vsub.s32 0, %v1896_v11 }
  0xd6   :  { %1401 = vmatprep.mubr.f32.mxu1 %v1842_v7 }
  0xd7   :  { %837 = vmatmul.mubr.f32.vlgmr.msra.gmra.mrb[0].mxu0 %v1910_v18 }
  0xd8   :  { %1403 = vmatmul.mubr.f32.vlgmr.msra.gmra.mrb[0].mxu1 %v1910_v18  ;;  %842 = vmatprep.mubr.f32.mxu0 %v1842_v7  ;;  %v33_v18 = vrot.slane %v1942_v33, %v32_v57  ;;  %v1424_v33 = vsub.s32 4, %v1896_v11 }
  0xd9   :  { %1408 = vmatprep.mubr.f32.mxu1 %v1842_v7 }
  0xda   :  { %v1720_v7 = vrot.slane %v33_v18, 11  ;;  %v36_v47 = vmul.f32 %v33_v18, %v1908_v17 }
  0xdb   :  { %844 = vmatmul.mubr.f32.gmra.mrb[2].mxu0 %v1912_v19 }
  0xdc   :  { %1410 = vmatmul.mubr.f32.gmra.mrb[2].mxu1 %v1912_v19  ;;  %v35_v19 = vmul.f32 %v33_v18, %v1903_v16  ;;  %v50_v60 = vsel %vm46_vm2, %v1720_v7, %v49_v38 }
  0xdd   :  { %v53_v53 = vadd.f32 %v50_v60, %v36_v47 }
  0xde   :  { %v52_v61 = vadd.f32 %v50_v60, %v35_v19 }
  0xdf   :  { %v1429_v36 = vrot.slane %v53_v53, %v1420_v62  ;;  %v1485_v17 = vrot.slane %v53_v53, %v1476_v37  ;;  %v1541_v41 = vrot.slane %v53_v53, %v1532_v46  ;;  %v1433_v32 = vrot.slane %v53_v53, %v1424_v33 }
  0xe0   :  { %v1421_v6 = vrot.slane %v52_v61, %v1420_v62  ;;  %v1477_v39 = vrot.slane %v52_v61, %v1476_v37  ;;  %v1533_v16 = vrot.slane %v52_v61, %v1532_v46  ;;  %v1425_v43 = vrot.slane %v52_v61, %v1424_v33 }
  0xe1   :  { %v1481_v21 = vrot.slane %v52_v61, %v1480_v0  ;;  %v1537_v23 = vrot.slane %v52_v61, %v1536_v5  ;;  %v1449_v54 = vrot.slane %v1429_v36, %v1420_v62  ;;  %v1505_v59 = vrot.slane %v1485_v17, %v1476_v37 }
  0xe2   :  { %v1441_v40 = vrot.slane %v1421_v6, %v1420_v62  ;;  %v1497_v50 = vrot.slane %v1477_v39, %v1476_v37  ;;  %v1553_v48 = vrot.slane %v1533_v16, %v1532_v46  ;;  %v1489_v4 = vrot.slane %v53_v53, %v1480_v0 }
  0xe3   :  { %v1545_v63 = vrot.slane %v53_v53, %v1536_v5  ;;  %v1561_v3 = vrot.slane %v1541_v41, %v1532_v46  ;;  %v1445_v51 = vrot.slane %v1425_v43, %v1420_v62  ;;  %v1501_v56 = vrot.slane %v1481_v21, %v1476_v37 }
  0xe4   :  { %v1557_v55 = vrot.slane %v1537_v23, %v1532_v46  ;;  %v1453_v52 = vrot.slane %v1433_v32, %v1420_v62  ;;  %v1509_v20 = vrot.slane %v1489_v4, %v1476_v37 }
  0xe5   :  { %v1565_v24 = vrot.slane %v1545_v63, %v1532_v46 }
 0x1aa   :  { %v838_v49 = vpop.f32.mrb[0].mxu0 }
 0x1ab   :  { %v1454_v9 = vmul.f32 %v1441_v40, %v838_v49  ;;  %v1510_v42 = vmul.f32 %v1497_v50, %v838_v49  ;;  %v1566_v27 = vmul.f32 %v1553_v48, %v838_v49  ;;  %v1404_v1 = vpop.f32.mrb[0].mxu1  ;;  %v840_v26 = vpop.f32.mrb[1].mxu0 }
 0x1ac   :  { %v1456_v44 = vmul.f32 %v1449_v54, %v1404_v1  ;;  %v1512_v10 = vmul.f32 %v1505_v59, %v1404_v1  ;;  %v1568_v12 = vmul.f32 %v1561_v3, %v1404_v1  ;;  %v1455_v29 = vmul.f32 %v1445_v51, %v840_v26  ;;  %v1406_v14 = vpop.f32.mrb[1].mxu1 }
 0x1ad   :  { %v1462_v15 = vrot.slane %v1454_v9, 7  ;;  %v1511_v45 = vmul.f32 %v1501_v56, %v840_v26  ;;  %v1518_v13 = vrot.slane %v1510_v42, 2  ;;  %v1567_v22 = vmul.f32 %v1557_v55, %v840_v26 }
 0x1ae   :  { %v1464_v25 = vrot.slane %v1456_v44, 7  ;;  %v1520_v30 = vrot.slane %v1512_v10, 2  ;;  %v2347_v31 = vpop.f32.mrb[2].mxu0  ;;  %v1463_v2 = vrot.slane %v1455_v29, 7  ;;  %v1457_v34 = vmul.f32 %v1453_v52, %v1406_v14 }
 0x1af   :  { %v1513_v35 = vmul.f32 %v1509_v20, %v1406_v14  ;;  %v2349_v57 = vpop.f32.mrb[2].mxu1  ;;  %v2351_v28 = vpop.f32.mrb[3].mxu0  ;;  %v1569_v18 = vmul.f32 %v1565_v24, %v1406_v14  ;;  %v1470_v58 = vadd.f32 %v1462_v15, %v2347_v31  ;;  %v1570_v7 = vmul.f32 %v1553_v48, %v2347_v31 }
 0x1b0   :  { %v1472_v38 = vadd.f32 %v1464_v25, %v2349_v57  ;;  %v2356_v19 = vpop.f32.mrb[3].mxu1  ;;  %v1583_v47 = vrot.slane %v1566_v27, 5  ;;  %v1589_v60 = vrot.slane %v1568_v12, 5  ;;  %v1465_v61 = vrot.slane %v1457_v34, 7 }
 0x1b1   :  { %v1572_v62 = vmul.f32 %v1561_v3, %v2349_v57  ;;  %v1519_v37 = vrot.slane %v1511_v45, 2  ;;  %v1526_v46 = vadd.f32 %v1518_v13, %v1470_v58  ;;  %v1584_v53 = vrot.slane %v1570_v7, 5 }
 0x1b2   :  { %v1528_v33 = vadd.f32 %v1520_v30, %v1472_v38  ;;  %v1471_v5 = vadd.f32 %v1463_v2, %v2351_v28  ;;  %v1571_v6 = vmul.f32 %v1557_v55, %v2351_v28  ;;  %v1473_v39 = vadd.f32 %v1465_v61, %v2356_v19 }
 0x1b3   :  { %v1590_v0 = vrot.slane %v1572_v62, 5  ;;  %v1586_v16 = vrot.slane %v1567_v22, 5  ;;  %v1521_v36 = vrot.slane %v1513_v35, 2  ;;  %v1585_v17 = vsel %vm1582_vm6, %v1583_v47, %v1584_v53 }
 0x1b4   :  { %v1573_v41 = vmul.f32 %v1565_v24, %v2356_v19  ;;  %v1599_v43 = vadd.f32 %v1585_v17, %v1526_v46  ;;  %v1527_v23 = vadd.f32 %v1519_v37, %v1471_v5  ;;  %v1587_v32 = vrot.slane %v1571_v6, 5 }
 0x1b5   :  { %v1591_v21 = vsel %vm1582_vm6, %v1589_v60, %v1590_v0  ;;  %v1592_v40 = vrot.slane %v1569_v18, 5  ;;  %v1529_v48 = vadd.f32 %v1521_v36, %v1473_v39 }
 0x1b6   :  { %v1601_v50 = vadd.f32 %v1591_v21, %v1528_v33  ;;  %v1593_v54 = vrot.slane %v1573_v41, 5  ;;  %v1603_v59 = vmul.f32 0.1, %v1599_v43  ;;  %v1588_v4 = vsel %vm1582_vm6, %v1586_v16, %v1587_v32 }
 0x1b7   :  { %v1600_v49 = vadd.f32 %v1588_v4, %v1527_v23  ;;  %v1845_v33 = vmov 1966171168  }
 0x1b8   :  { %v1605_v63 = vmul.f32 0.1, %v1601_v50  ;;  %v1594_v3 = vsel %vm1582_vm6, %v1592_v40, %v1593_v54  ;;  %v1607_v51 = vmax.f32 %v1599_v43, %v1603_v59  ;;  %v1678_v0 = vunpack.c.l.s4 %v1845_v33 }
 0x1b9   :  { %v1602_v56 = vadd.f32 %v1594_v3, %v1529_v48  ;;  %v1604_v9 = vmul.f32 0.1, %v1600_v49 }
 0x1ba   :  { %v1609_v55 = vmax.f32 %v1601_v50, %v1605_v63  ;;  %v1615_v42 = vrot.slane %v1607_v51, 5  ;;  %v1679_v21 = vunpack.c.0.s8 %v1678_v0 }
 0x1bb   :  { %v1606_v27 = vmul.f32 0.1, %v1602_v56  ;;  %v1608_v26 = vmax.f32 %v1600_v49, %v1604_v9 }
 0x1bc   :  { %v1617_v1 = vrot.slane %v1609_v55, 5  ;;  %v1623_v52 = vmul.f32 %v1615_v42, %v2347_v31  ;;  %v1682_v59 = vsub.s32 %v1679_v21, %v1896_v11 }
 0x1bd   :  { %v1610_v44 = vmax.f32 %v1602_v56, %v1606_v27  ;;  %v1616_v12 = vrot.slane %v1608_v26, 5 }
 0x1be   :  { %v1625_v10 = vmul.f32 %v1617_v1, %v2349_v57  ;;  %v1631_v29 = vrot.slane %v1623_v52, 4 }
 0x1bf   :  { %v1618_v14 = vrot.slane %v1610_v44, 5  ;;  %v1624_v45 = vmul.f32 %v1616_v12, %v2351_v28 }
 0x1c0   :  { %v1633_v15 = vrot.slane %v1625_v10, 4  ;;  %v1639_v20 = vsel %vm1582_vm6, %v1631_v29, 0.0 }
 0x1c1   :  { %v1626_v24 = vmul.f32 %v1618_v14, %v2356_v19  ;;  %v1640_v13 = vrot.slane %v1639_v20, 4  ;;  %v1632_v30 = vrot.slane %v1624_v45, 4 }
 0x1c2   :  { %v1653_v25 = vsel %vm1582_vm6, %v1633_v15, 0.0 }
 0x1c3   :  { %v1654_v2 = vrot.slane %v1653_v25, 4  ;;  %v1634_v22 = vrot.slane %v1626_v24, 4  ;;  %v1641_v34 = vadd.f32 %v1640_v13, %v1639_v20  ;;  %v1646_v35 = vsel %vm1582_vm6, %v1632_v30, 0.0 }
 0x1c4   :  { %v1647_v58 = vrot.slane %v1646_v35, 4 }
 0x1c5   :  { %v1655_v18 = vadd.f32 %v1654_v2, %v1653_v25  ;;  %v1660_v7 = vsel %vm1582_vm6, %v1634_v22, 0.0  ;;  %v1642_v38 = vrot.slane %v1641_v34, 2 }
 0x1c6   :  { %v1661_v47 = vrot.slane %v1660_v7, 4  ;;  %v1648_v61 = vadd.f32 %v1647_v58, %v1646_v35 }
 0x1c7   :  { %v1656_v60 = vrot.slane %v1655_v18, 2  ;;  %v1643_v62 = vadd.f32 %v1642_v38, %v1641_v34 }
 0x1c8   :  { %v1662_v37 = vadd.f32 %v1661_v47, %v1660_v7  ;;  %v1649_v53 = vrot.slane %v1648_v61, 2 }
 0x1c9   :  { %v1657_v46 = vadd.f32 %v1656_v60, %v1655_v18  ;;  %v1644_v5 = vrot.slane %v1643_v62, 1 }
 0x1ca   :  { %v1663_v6 = vrot.slane %v1662_v37, 2  ;;  %v1650_v16 = vadd.f32 %v1649_v53, %v1648_v61 }
 0x1cb   :  { %v1658_v39 = vrot.slane %v1657_v46, 1  ;;  %v1645_v36 = vadd.f32 %v1644_v5, %v1643_v62 }
 0x1cc   :  { %v1664_v17 = vadd.f32 %v1663_v6, %v1662_v37  ;;  %v1651_v43 = vrot.slane %v1650_v16, 1 }
 0x1cd   :  { %v1659_v41 = vadd.f32 %v1658_v39, %v1657_v46  ;;  %v1667_v23 = vadd.f32 %v1645_v36, %v2347_v31 }
 0x1ce   :  { %v1665_v32 = vrot.slane %v1664_v17, 1  ;;  %v1652_v50 = vadd.f32 %v1651_v43, %v1650_v16 }
 0x1cf   :  { %v1669_v40 = vadd.f32 %v1659_v41, %v2349_v57 }
 0x1d0   :  { %v1666_v48 = vadd.f32 %v1665_v32, %v1664_v17  ;;  %v1668_v54 = vadd.f32 %v1652_v50, %v2351_v28 }
 0x1d2   :  { %v1670_v4 = vadd.f32 %v1666_v48, %v2356_v19  ;;  %v1675_v63 = vcombine.high %v1667_v23, %v1668_v54 }
 0x1d4   :  { %v1676_v49 = vcombine.high %v1669_v40, %v1670_v4  ;;  %v1683_v3 = vrot.slane %v1675_v63, %v1682_v59 }
 0x1d6   :  { %v1690_v51 = vrot.slane %v1676_v49, %v1682_v59 }
 0x1d8   :  { %v1691_v56 = vcombine.high %v1683_v3, %v1690_v51 }
 0x1da   :  { %v1698_v55 = vrot.slane %v1691_v56, %v1682_v59 }
 0x1dc   :  { %v1699_v31 = vcombine.high %v1698_v55, %v1698_v55 }
 0x1de   :  { %1705 = vst.msk [vmem:[#allocation2] sm:$0xf] %vm1703_vm3, %v1699_v31 }
 0x1df   :  { %1828 = shalt.err (!%p1825_p4)
}
 0x1e0   :  { %s1829_s7 = scalar_lea.hbm %s2396_s3, 64 }
 0x1e1   :  { %p1830_p5 = scmp.ne.s32.totalorder %s2396_s3, %s1829_s7  ;;  %p1833_p6 = scmp.lt.u32.totalorder %s1829_s7, %s2396_s3 }
 0x1e3   :  { %p1835_p7 = pnand %p1833_p6, %p1830_p5 }
 0x1e5   :  { %1838 = shalt.err (!%p1835_p7)
}
 0x1e6   :  { %1715 = dma.vmem_to_hbm [thread:$0]  %s1713_s2, 64, %s2396_s3, [#allocation3]  }
 0x1e7   :  { %1839 = dma.done.wait [#allocation3], 64  }
 0x1e8   :  { %1840 = vsyncadd [#allocation3], 4294967232 }
 0x1e9   :  { %1719 = vsyncpa [#allocation3], 1 }

</bundles_post_ra>
